<compile_context>
chip_gen: v7x
topology: tpu7x:2x2x1
jax: 0.10.0
libtpu: 0.0.40
codegen_flags: <defaults>
</compile_context>

<pallas_src>
import functools

import jax
import jax.numpy as jnp
from jax.experimental import pallas as pl
from jax.experimental.pallas import tpu as pltpu

LANES = 128                            # lane width of the flattened slab
TARGET_BLOCK_BYTES = 2 * 1024 * 1024   # ~2 MiB / data stream / pipeline buffer
ROW_MULT = 32                          # sublane multiple valid for int8 masks & f32/bf16 data
MIN_SPLIT_ROWS = 256                   # above this, force >=2 grid steps (megacore)
VMEM_LIMIT_BYTES = 48 * 1024 * 1024    # <= v7x per-TC budget, raises v5e's 16 MiB default


def _round_up(x, m):
    return ((x + m - 1) // m) * m


def _dc_kernel(*refs, rep, soft):
    """Elementwise DC update on one (pp, tile, LANES) block."""
    i = 0
    if soft:
        w_ref = refs[i]; i += 1
    if rep > 1:
        exp_ref = refs[i]; i += 1
    mask_ref, k_ref, u_ref, out_ref = refs[i:i + 4]

    if rep > 1:
        # (1 - mask) at 1/rep lane width, expanded to full lane width with a
        # tiny 0/1 matmul on the otherwise-idle MXU (exact for binary masks).
        mn_small = 1.0 - mask_ref[...].astype(exp_ref.dtype)        # (tile, mw)
        mn = jnp.dot(mn_small, exp_ref[...],
                     preferred_element_type=jnp.float32)            # (tile, LANES)
    else:
        mn = 1.0 - mask_ref[...].astype(jnp.float32)                # (tile, LANES)

    k = k_ref[...].astype(jnp.float32)                              # (pp, tile, LANES)
    u = u_ref[...].astype(jnp.float32)
    if soft:
        w = w_ref[0]                                                # dc_weight (SMEM)
        out = mn * (k * (1.0 - w)) + u * w
    else:
        out = mn * k + u
    out_ref[...] = out.astype(out_ref.dtype)


def dc_layer2c(k_rec, mask, uk, *, soft=False, dc_weight=None):
    """Pallas TPU implementation of DC_layer2c.forward."""
    orig_shape = k_rec.shape
    out_dtype = k_rec.dtype
    nd = k_rec.ndim
    total = k_rec.size

    # torch: mask.unsqueeze(-1) when it has fewer dims; then plain broadcasting.
    if mask.ndim < nd:
        mask = mask[..., None]
    if mask.ndim < nd:
        mask = mask.reshape((1,) * (nd - mask.ndim) + mask.shape)   # metadata only
    if mask.ndim != nd:
        raise ValueError("mask rank may not exceed k_rec rank")

    if uk.shape != k_rec.shape:
        # TODO(synk): uk is normally full-shaped measured k-space; rare broadcast
        # falls back to materialization.
        uk = jnp.broadcast_to(uk, k_rec.shape)
    if uk.dtype != out_dtype:
        uk = uk.astype(out_dtype)

    # Mask dtype policy: bool/int masks travel as int8 (exact, 4-8x less HBM
    # traffic); float masks keep float operands.  The in-kernel expansion is
    # exact for 0/1-valued masks (the MRI undersampling case).
    if jnp.issubdtype(mask.dtype, jnp.bool_) or jnp.issubdtype(mask.dtype, jnp.integer):
        mask = mask.astype(jnp.int8)
        exp_dtype = jnp.bfloat16
    else:
        if mask.dtype not in (jnp.float32, jnp.bfloat16):
            mask = mask.astype(jnp.float32)
        exp_dtype = mask.dtype

    last = k_rec.shape[-1]
    mlast = mask.shape[-1]

    # Trailing (complex) dim broadcast handled in-kernel via `rep`.
    if mlast == last:
        rep = 1
    elif mlast == 1 and LANES % last == 0:
        rep = last
    else:
        rep = 0  # unsupported trailing extent -> fallback

    # Leading-dim broadcast handled via grid/index_map (no materialization):
    # data is (n_periods, period_rows, LANES); mask index_map ignores periods.
    struct_ok = rep > 0
    j = 0
    if struct_ok:
        lead_m, lead_k = mask.shape[:-1], k_rec.shape[:-1]
        j = len(lead_m)
        while j > 0 and lead_m[j - 1] == lead_k[j - 1]:
            j -= 1
        if any(d != 1 for d in lead_m[:j]):
            struct_ok = False          # broadcast in a middle dim -> fallback
    if struct_ok:
        period_elems = 1
        for d in k_rec.shape[j:]:
            period_elems *= d
        if period_elems % LANES != 0 or period_elems // LANES < 8:
            struct_ok = False          # unaligned / tiny period -> fallback

    padded = False
    if struct_ok:
        n_periods = total // period_elems
        period_rows = period_elems // LANES
        mw = LANES // rep
        k3 = k_rec.reshape(n_periods, period_rows, LANES)
        u3 = uk.reshape(n_periods, period_rows, LANES)
        m2 = mask.reshape(period_rows, mw)
    else:
        # Last-resort path (odd shapes only): materialize the mask broadcast
        # and pad the flat slab to a lane-dense multiple.
        rep = 1
        mw = LANES
        mask = jnp.broadcast_to(mask, k_rec.shape)
        rows = _round_up(max(1, pl.cdiv(total, LANES)), 8)
        pad = rows * LANES - total
        kf, uf, mf = k_rec.reshape(-1), uk.reshape(-1), mask.reshape(-1)
        if pad:
            kf = jnp.pad(kf, (0, pad))
            uf = jnp.pad(uf, (0, pad))
            mf = jnp.pad(mf, (0, pad))    # masknot=1 on zero pad -> padded out = 0
            padded = True
        n_periods, period_rows = 1, rows
        k3 = kf.reshape(1, rows, LANES)
        u3 = uf.reshape(1, rows, LANES)
        m2 = mf.reshape(rows, mw)

    # ---- block / grid selection -------------------------------------------
    itemsize = jnp.dtype(out_dtype).itemsize
    target_rows = max(ROW_MULT,
                      (TARGET_BLOCK_BYTES // (LANES * itemsize)) // ROW_MULT * ROW_MULT)
    if period_rows >= target_rows:
        tile, pp = target_rows, 1
    else:
        tile, pp = period_rows, max(1, min(n_periods, target_rows // period_rows))
    period_blocks = pl.cdiv(n_periods, pp)
    row_blocks = pl.cdiv(period_rows, tile)

    # Guarantee >=2 parallel grid steps for sizeable problems so a v7x
    # megacore can shard the work across both TensorCores.
    if period_blocks * row_blocks == 1 and n_periods * period_rows >= MIN_SPLIT_ROWS:
        if n_periods >= 2:
            pp = pl.cdiv(n_periods, 2)
            period_blocks = pl.cdiv(n_periods, pp)
        else:
            tile = _round_up(pl.cdiv(period_rows, 2), ROW_MULT)
            row_blocks = pl.cdiv(period_rows, tile)

    grid = (period_blocks, row_blocks)

    data_spec = pl.BlockSpec((pp, tile, LANES), lambda p, i: (p, i, 0))
    mask_spec = pl.BlockSpec((tile, mw), lambda p, i: (i, 0))      # ignores the period axis

    in_specs, args = [], []
    if soft:
        if dc_weight is None:
            raise ValueError("soft=True requires dc_weight")
        in_specs.append(pl.BlockSpec(memory_space=pltpu.MemorySpace.SMEM))
        args.append(jnp.asarray(dc_weight, jnp.float32).reshape((1,)))
    if rep > 1:
        # Constant interleaved-repeat expansion matrix, hoisted out of the
        # kernel; constant index_map -> DMA'd into VMEM exactly once.
        expand = jnp.repeat(jnp.eye(mw, dtype=exp_dtype), rep, axis=1)   # (mw, LANES)
        in_specs.append(pl.BlockSpec((mw, LANES), lambda p, i: (0, 0)))
        args.append(expand)
    in_specs += [mask_spec, data_spec, data_spec]
    args += [m2, k3, u3]

    out_bytes = n_periods * period_rows * LANES * itemsize
    cost = pl.CostEstimate(
        flops=(4 if soft else 2) * total,
        transcendentals=0,
        bytes_accessed=int(k3.size * k3.dtype.itemsize + u3.size * u3.dtype.itemsize
                           + m2.size * m2.dtype.itemsize + out_bytes),
    )

    kernel = functools.partial(_dc_kernel, rep=rep, soft=soft)
    out3 = pl.pallas_call(
        kernel,
        out_shape=jax.ShapeDtypeStruct((n_periods, period_rows, LANES), out_dtype),
        grid=grid,
        in_specs=in_specs,
        out_specs=data_spec,
        compiler_params=pltpu.CompilerParams(
            dimension_semantics=("parallel", "parallel"),
            vmem_limit_bytes=VMEM_LIMIT_BYTES),
        cost_estimate=cost,
    )(*args)

    out_flat = out3.reshape(-1)
    if padded:
        out_flat = out_flat[:total]
    return out_flat.reshape(orig_shape)


def _reference(k_rec, mask, uk, soft=False, dc_weight=None):
    if mask.ndim < k_rec.ndim:
        mask = mask[..., None]
    masknot = 1.0 - mask.astype(jnp.float32)
    if soft:
        return masknot * k_rec * (1.0 - dc_weight) + uk * dc_weight
    return masknot * k_rec + uk


if __name__ == "__main__":
    key = jax.random.PRNGKey(0)
    k1, k2, k3, k4, k5, k6 = jax.random.split(key, 6)

    # (a)/(b): full-shape binary float mask (B, C, H, W), complex dim = 2
    B, C, H, W = 2, 4, 16, 16
    k_rec = jax.random.normal(k1, (B, C, H, W, 2), dtype=jnp.float32)
    uk = jax.random.normal(k2, (B, C, H, W, 2), dtype=jnp.float32)
    mask = (jax.random.uniform(k3, (B, C, H, W)) > 0.5).astype(jnp.float32)

    out_hard = dc_layer2c(k_rec, mask, uk, soft=False)
    jax.block_until_ready(out_hard)
    ref_hard = _reference(k_rec, mask, uk, soft=False)
    assert out_hard.shape == k_rec.shape
    assert jnp.allclose(out_hard, ref_hard, atol=1e-6), "hard DC mismatch"

    # soft DC: module-init weight (ones(1)) and a generic learned value
    for wval in (jnp.ones((1,), jnp.float32)[0], jnp.float32(0.37)):
        out_soft = dc_layer2c(k_rec, mask, uk, soft=True, dc_weight=wval)
        jax.block_until_ready(out_soft)
        ref_soft = _reference(k_rec, mask, uk, soft=True, dc_weight=wval)
        assert jnp.allclose(out_soft, ref_soft, atol=1e-6), "soft DC mismatch"

    # (c): bool mask shared across batch & coils -> leading-dim broadcast stays
    # in the index_map, mask travels as int8, bf16 expansion matmul.
    H2, W2 = 32, 16
    k_rec2 = jax.random.normal(k4, (B, C, H2, W2, 2), dtype=jnp.float32)
    uk2 = jax.random.normal(k5, (B, C, H2, W2, 2), dtype=jnp.float32)
    mask2 = jax.random.uniform(k6, (H2, W2)) > 0.5          # bool, shape (H2, W2)
    out2 = dc_layer2c(k_rec2, mask2, uk2, soft=False)
    jax.block_until_ready(out2)
    ref2 = _reference(k_rec2, mask2, uk2, soft=False)
    assert jnp.allclose(out2, ref2, atol=1e-6), "broadcast-mask DC mismatch"

    # (d): unaligned shape exercising the last-resort padded path
    k_rec3 = jax.random.normal(k1, (1, 2, 10, 10, 2), dtype=jnp.float32)
    uk3 = jax.random.normal(k2, (1, 2, 10, 10, 2), dtype=jnp.float32)
    mask3 = (jax.random.uniform(k3, (1, 2, 10, 10)) > 0.5).astype(jnp.float32)
    out3 = dc_layer2c(k_rec3, mask3, uk3, soft=False)
    jax.block_until_ready(out3)
    ref3 = _reference(k_rec3, mask3, uk3, soft=False)
    assert jnp.allclose(out3, ref3, atol=1e-6), "padded-path DC mismatch"

    print("KERNEL_OK")
</pallas_src>

<mosaic_0001>
module attributes {stable_mosaic.version = 11 : i64} {
  func.func @_dc_kernel(%arg0: i32, %arg1: i32, %arg2: memref<64x128xf32, #tpu.memory_space<vmem>>, %arg3: memref<32x64xf32, #tpu.memory_space<vmem>>, %arg4: memref<1x32x128xf32, #tpu.memory_space<vmem>>, %arg5: memref<1x32x128xf32, #tpu.memory_space<vmem>>, %arg6: memref<1x32x128xf32, #tpu.memory_space<vmem>>) attributes {dimension_semantics = [#tpu.dimension_semantics<parallel>, #tpu.dimension_semantics<parallel>], iteration_bounds = array<i64: 1, 1>, scalar_prefetch = 0 : i64, scratch_operands = 0 : i64, tpu.core_type = #tpu.core_type<tc>, window_params = [{pipeline_mode = #tpu.pipeline_mode<synchronous>, transform_indices = @transform_0, window_bounds = array<i64: 64, 128>}, {transform_indices = @transform_1, window_bounds = array<i64: 32, 64>}, {transform_indices = @transform_2, window_bounds = array<i64: 1, 32, 128>}, {transform_indices = @transform_3, window_bounds = array<i64: 1, 32, 128>}, {transform_indices = @transform_4, window_bounds = array<i64: 1, 32, 128>}]} {
    %c0 = arith.constant 0 : index
    %c0_0 = arith.constant 0 : index
    %0 = vector.load %arg3[%c0, %c0_0] : memref<32x64xf32, #tpu.memory_space<vmem>>, vector<32x64xf32>
    %cst = arith.constant 1.000000e+00 : f32
    %1 = vector.broadcast %cst : f32 to vector<32x64xf32>
    %2 = arith.subf %1, %0 : vector<32x64xf32>
    %c0_1 = arith.constant 0 : index
    %c0_2 = arith.constant 0 : index
    %3 = vector.load %arg2[%c0_1, %c0_2] : memref<64x128xf32, #tpu.memory_space<vmem>>, vector<64x128xf32>
    %cst_3 = arith.constant dense<0.000000e+00> : vector<32x128xf32>
    %4 = tpu.matmul %2, %3, %cst_3 {dimension_numbers = #tpu.dot_dimension_numbers<[1], [0], [0], [1], [0, 0, 1, 1], [], []>} : vector<32x64xf32>, vector<64x128xf32>, vector<32x128xf32> -> vector<32x128xf32>
    %c0_4 = arith.constant 0 : index
    %c0_5 = arith.constant 0 : index
    %c0_6 = arith.constant 0 : index
    %5 = vector.load %arg4[%c0_4, %c0_5, %c0_6] : memref<1x32x128xf32, #tpu.memory_space<vmem>>, vector<1x32x128xf32>
    %c0_7 = arith.constant 0 : index
    %c0_8 = arith.constant 0 : index
    %c0_9 = arith.constant 0 : index
    %6 = vector.load %arg5[%c0_7, %c0_8, %c0_9] : memref<1x32x128xf32, #tpu.memory_space<vmem>>, vector<1x32x128xf32>
    %7 = vector.shape_cast %4 : vector<32x128xf32> to vector<1x32x128xf32>
    %8 = arith.mulf %7, %5 : vector<1x32x128xf32>
    %9 = arith.addf %8, %6 : vector<1x32x128xf32>
    %c0_10 = arith.constant 0 : index
    %c0_11 = arith.constant 0 : index
    %c0_12 = arith.constant 0 : index
    %10 = vector.load %arg6[%c0_10, %c0_11, %c0_12] : memref<1x32x128xf32, #tpu.memory_space<vmem>>, vector<1x32x128xf32>
    tpu.vector_store %arg6[%c0_10, %c0_11, %c0_12], %9 {strides = array<i32>} : memref<1x32x128xf32, #tpu.memory_space<vmem>>, vector<1x32x128xf32>,
    return
  }
  func.func @transform_0(%arg0: i32, %arg1: i32) -> (i32, i32) {
    %c0_i32 = arith.constant 0 : i32
    %c0_i32_0 = arith.constant 0 : i32
    %c0_i32_1 = arith.constant 0 : i32
    return %c0_i32, %c0_i32_0 : i32, i32
  }
  func.func @transform_1(%arg0: i32, %arg1: i32) -> (i32, i32) {
    %c0_i32 = arith.constant 0 : i32
    %c0_i32_0 = arith.constant 0 : i32
    return %arg1, %c0_i32 : i32, i32
  }
  func.func @transform_2(%arg0: i32, %arg1: i32) -> (i32, i32, i32) {
    %c0_i32 = arith.constant 0 : i32
    %c0_i32_0 = arith.constant 0 : i32
    return %arg0, %arg1, %c0_i32 : i32, i32, i32
  }
  func.func @transform_3(%arg0: i32, %arg1: i32) -> (i32, i32, i32) {
    %c0_i32 = arith.constant 0 : i32
    %c0_i32_0 = arith.constant 0 : i32
    return %arg0, %arg1, %c0_i32 : i32, i32, i32
  }
  func.func @transform_4(%arg0: i32, %arg1: i32) -> (i32, i32, i32) {
    %c0_i32 = arith.constant 0 : i32
    %c0_i32_0 = arith.constant 0 : i32
    return %arg0, %arg1, %c0_i32 : i32, i32, i32
  }
}

</mosaic_0001>

<bundles_post_ra>
// kernel: tpu_custom_call.1
= control target key start
LH: loop header
LB: loop body
LE: loop exit
PB: predicated region body
PF: predicated region fallthrough
CT: control target
= control target key end

     0   :  { %9 = vsyncpa [#allocation3], 0  ;;  %s538_s0 = inlined_call_operand.hbm [shape: f32[64,128], index: 0, kind: input, shape index: {}]   ;;  %s539_s1 = inlined_call_operand.hbm [shape: f32[32,64], index: 1, kind: input, shape index: {}]   ;;  %s540_s2 = inlined_call_operand.hbm [shape: f32[1,32,128], index: 2, kind: input, shape index: {}]   ;;  %s541_s3 = inlined_call_operand.hbm [shape: f32[1,32,128], index: 3, kind: input, shape index: {}]   ;;  %s542_s4 = inlined_call_operand.hbm [shape: f32[1,32,128], index: 4, kind: output, shape index: {}]  }
   0x1   :  { %10 = vsyncpa [#allocation6], 0 }
   0x2   :  { %11 = vsyncpa [#allocation9], 0 }
   0x3   :  { %12 = vsyncpa [#allocation4], 0  ;;  %s413_s15 = smov [#allocation5]   ;;  %s414_s17 = smov [#allocation2]  }
   0x4   :  { %s30_s16 = sshll.u32 %s413_s15, 4  ;;  %s18_s18 = sshll.u32 %s414_s17, 4  ;;  %s31_s16 = int_to_ptr.vmem [resolvable:$true] %s30_s16  ;;  %s445_s18 = int_to_ptr.vmem [resolvable:$true] %s18_s18 }
   0x5   :  { %s295_s21 = scalar_lea.hbm %s539_s1, 512 }
   0x6   :  { %p296_p0 = scmp.ne.s32.totalorder %s539_s1, %s295_s21  ;;  %p299_p1 = scmp.lt.u32.totalorder %s295_s21, %s539_s1 }
   0x8   :  { %p301_p2 = pnand %p299_p1, %p296_p0 }
   0xa   :  { %304 = shalt.err (!%p301_p2)
}
   0xb   :  { %s305_s26 = scalar_lea.vmem %s31_s16, 512  ;;  %p310_p4 = scmp.lt.s32.totalorder %s31_s16, %s31_s16 }
   0xc   :  { %p306_p3 = scmp.ne.s32.totalorder %s31_s16, %s305_s26  ;;  %p311_p5 = scmp.lt.s32.totalorder %s305_s26, %s305_s26 }
   0xe   :  { %p312_p6 = por %p311_p5, %p310_p4 }
  0x10   :  { %p313_p7 = pnand %p312_p6, %p306_p3 }
  0x12   :  { %316 = shalt.err (!%p313_p7)
}
  0x13   :  { %s415_s27 = smov 128   ;;  %s416_s28 = smov 8  }
  0x14   :  { %36 = dma.hbm_to_vmem [thread:$0]  %s539_s1, 512, %s31_s16, [#allocation6], %s415_s27, %s415_s27, %s416_s28  }
  0x15   :  { %s317_s7 = scalar_lea.hbm %s538_s0, 1024 }
  0x16   :  { %p318_p8 = scmp.ne.s32.totalorder %s538_s0, %s317_s7  ;;  %p321_p9 = scmp.lt.u32.totalorder %s317_s7, %s538_s0 }
  0x18   :  { %p323_p10 = pnand %p321_p9, %p318_p8 }
  0x1a   :  { %326 = shalt.err (!%p323_p10)
}
  0x1b   :  { %s327_s12 = scalar_lea.vmem %s445_s18, 1024  ;;  %p332_p12 = scmp.lt.s32.totalorder %s445_s18, %s445_s18 }
  0x1c   :  { %p328_p11 = scmp.ne.s32.totalorder %s445_s18, %s327_s12  ;;  %p333_p13 = scmp.lt.s32.totalorder %s327_s12, %s327_s12 }
  0x1e   :  { %p334_p0 = por %p333_p13, %p332_p12 }
  0x20   :  { %p335_p1 = pnand %p334_p0, %p328_p11 }
  0x22   :  { %338 = shalt.err (!%p335_p1)
}
  0x23   :  { %24 = dma.hbm_to_vmem [thread:$0]  %s538_s0, 1024, %s445_s18, [#allocation3], %s415_s27, %s415_s27, %s416_s28  }
  0x24   :  { %s417_s14 = smov [#allocation7]   ;;  %s418_s16 = smov [#allocation8]  }
  0x25   :  { %s42_s15 = sshll.u32 %s417_s14, 4  ;;  %s54_s17 = sshll.u32 %s418_s16, 4  ;;  %s43_s15 = int_to_ptr.vmem [resolvable:$true] %s42_s15  ;;  %s482_s17 = int_to_ptr.vmem [resolvable:$true] %s54_s17 }
  0x26   :  { %s339_s21 = scalar_lea.hbm %s540_s2, 512 }
  0x27   :  { %p340_p2 = scmp.ne.s32.totalorder %s540_s2, %s339_s21  ;;  %p343_p3 = scmp.lt.u32.totalorder %s339_s21, %s540_s2 }
  0x29   :  { %p345_p4 = pnand %p343_p3, %p340_p2 }
  0x2b   :  { %348 = shalt.err (!%p345_p4)
}
  0x2c   :  { %s349_s0 = scalar_lea.vmem %s43_s15, 512  ;;  %p354_p6 = scmp.lt.s32.totalorder %s43_s15, %s43_s15 }
  0x2d   :  { %p350_p5 = scmp.ne.s32.totalorder %s43_s15, %s349_s0  ;;  %p355_p7 = scmp.lt.s32.totalorder %s349_s0, %s349_s0 }
  0x2f   :  { %p356_p8 = por %p355_p7, %p354_p6 }
  0x31   :  { %p357_p9 = pnand %p356_p8, %p350_p5 }
  0x33   :  { %360 = shalt.err (!%p357_p9)
}
  0x34   :  { %48 = dma.hbm_to_vmem [thread:$0]  %s540_s2, 512, %s43_s15, [#allocation6], %s415_s27, %s415_s27, %s416_s28  }
  0x35   :  { %s361_s5 = scalar_lea.hbm %s541_s3, 512 }
  0x36   :  { %p362_p10 = scmp.ne.s32.totalorder %s541_s3, %s361_s5  ;;  %p365_p11 = scmp.lt.u32.totalorder %s361_s5, %s541_s3 }
  0x38   :  { %p367_p12 = pnand %p365_p11, %p362_p10 }
  0x3a   :  { %370 = shalt.err (!%p367_p12)
}
  0x3b   :  { %s371_s10 = scalar_lea.vmem %s482_s17, 512  ;;  %p376_p0 = scmp.lt.s32.totalorder %s482_s17, %s482_s17 }
  0x3c   :  { %p372_p13 = scmp.ne.s32.totalorder %s482_s17, %s371_s10  ;;  %p377_p1 = scmp.lt.s32.totalorder %s371_s10, %s371_s10 }
  0x3e   :  { %p378_p2 = por %p377_p1, %p376_p0 }
  0x40   :  { %p379_p3 = pnand %p378_p2, %p372_p13 }
  0x42   :  { %382 = shalt.err (!%p379_p3)
}
  0x43   :  { %60 = dma.hbm_to_vmem [thread:$0]  %s541_s3, 512, %s482_s17, [#allocation9], %s415_s27, %s415_s27, %s416_s28  }
  0x44   :  { %405 = dma.done.wait [#allocation3], 1024  }
  0x45   :  { %406 = vsyncadd [#allocation3], 4294966272 }
  0x46   :  { %407 = dma.done.wait [#allocation6], 1024  }
  0x47   :  { %408 = vsyncadd [#allocation6], 4294966272 }
  0x48   :  { %409 = dma.done.wait [#allocation9], 512  }
  0x49   :  { %410 = vsyncadd [#allocation9], 4294966784  ;;  %v81_v0 = vld [vmem:[#allocation2] sm:$0xff]  ;;  %v82_v1 = vld [vmem:[#allocation2 + $0x8] sm:$0xff]  ;;  %vm89_vm0 = vcmask 523264   ;;  %s419_s3 = smov [#allocation10]  }
  0x4a   :  { %v83_v2 = vld [vmem:[#allocation2 + $0x10] sm:$0xff]  ;;  %v264_v3 = vpack.c.bf16 %v82_v1, %v81_v0  ;;  %v84_v4 = vld [vmem:[#allocation2 + $0x18] sm:$0xff]  ;;  %v85_v6 = vld [vmem:[#allocation2 + $0x20] sm:$0xff]  ;;  %s212_s12 = sshll.u32 %s419_s3, 4  ;;  %s213_s12 = int_to_ptr.vmem [resolvable:$true] %s212_s12 }
  0x4b   :  { %v268_v5 = vpack.c.bf16 %v84_v4, %v83_v2  ;;  %v86_v7 = vld [vmem:[#allocation2 + $0x28] sm:$0xff]  ;;  %v73_v8 = vld [vmem:[#allocation5] sm:$0xff]  ;;  %v75_v10 = vld [vmem:[#allocation5 + $0x10] sm:$0xff]  ;;  %s383_s1 = scalar_lea.vmem %s213_s12, 512  ;;  %p388_p5 = scmp.lt.s32.totalorder %s213_s12, %s213_s12 }
  0x4c   :  { %265 = vmatprep.subr.bf16.mxu0 %v264_v3  ;;  %280 = vmatprep.subr.bf16.mxu1 %v264_v3  ;;  %v77_v9 = vsub.f32 1.0, %v73_v8  ;;  %v79_v11 = vsub.f32 1.0, %v75_v10  ;;  %v272_v12 = vpack.c.bf16 %v86_v7, %v85_v6  ;;  %v87_v13 = vld [vmem:[#allocation2 + $0x30] sm:$0xff]  ;;  %v88_v14 = vld [vmem:[#allocation2 + $0x38] sm:$0xff]  ;;  %v74_v16 = vld [vmem:[#allocation5 + $0x8] sm:$0xff]  ;;  %p384_p4 = scmp.ne.s32.totalorder %s213_s12, %s383_s1  ;;  %p389_p6 = scmp.lt.s32.totalorder %s383_s1, %s383_s1 }
  0x4d   :  { %267 = vmatpush3.bf16.msra.mxu0 %v264_v3  ;;  %284 = vmatpush3.bf16.msra.mxu1 %v264_v3  ;;  %v276_v15 = vpack.c.bf16 %v88_v14, %v87_v13  ;;  %v76_v17 = vld [vmem:[#allocation5 + $0x18] sm:$0xff]  ;;  %v78_v18 = vsub.f32 1.0, %v74_v16  ;;  %v188_v20 = vld [vmem:[#allocation7 + $0x8] sm:$0xff]  ;;  %v187_v22 = vld [vmem:[#allocation7] sm:$0xff] }
  0x4e   :  { %269 = vmatprep.subr.bf16.mxu0 %v268_v5  ;;  %281 = vmatprep.subr.bf16.mxu1 %v268_v5  ;;  %v80_v19 = vsub.f32 1.0, %v76_v17  ;;  %v190_v21 = vld [vmem:[#allocation7 + $0x18] sm:$0xff]  ;;  %v189_v23 = vld [vmem:[#allocation7 + $0x10] sm:$0xff]  ;;  %v192_v25 = vld [vmem:[#allocation8 + $0x8] sm:$0xff]  ;;  %p390_p7 = por %p389_p6, %p388_p5 }
  0x4f   :  { %258 = vmatprep.mubr.msk.f32.mxu0 %vm89_vm0, %v77_v9  ;;  %261 = vmatprep.mubr.msk.f32.mxu1 %vm89_vm0, %v79_v11  ;;  %v194_v27 = vld [vmem:[#allocation8 + $0x18] sm:$0xff]  ;;  %v191_v31 = vld [vmem:[#allocation8] sm:$0xff]  ;;  %v193_v33 = vld [vmem:[#allocation8 + $0x10] sm:$0xff] }
  0x50   :  { %p391_p8 = pnand %p390_p7, %p384_p4 }
  0x51   :  { %271 = vmatpush3.bf16.msra.mxu0 %v268_v5  ;;  %285 = vmatpush3.bf16.msra.mxu1 %v268_v5 }
  0x52   :  { %273 = vmatprep.subr.bf16.mxu0 %v272_v12  ;;  %282 = vmatprep.subr.bf16.mxu1 %v272_v12 }
  0x55   :  { %275 = vmatpush3.bf16.msra.mxu0 %v272_v12  ;;  %286 = vmatpush3.bf16.msra.mxu1 %v272_v12 }
  0x56   :  { %277 = vmatprep.subr.bf16.mxu0 %v276_v15  ;;  %283 = vmatprep.subr.bf16.mxu1 %v276_v15 }
  0x59   :  { %279 = vmatpush3.bf16.msra.mxu0 %v276_v15  ;;  %287 = vmatpush3.bf16.msra.mxu1 %v276_v15 }
  0x5c   :  { %259 = vmatmul.mubr.msk.f32.vlgmr.msra.gmra.mrb[0].mxu0 %vm89_vm0, %v78_v18  ;;  %262 = vmatmul.mubr.msk.f32.vlgmr.msra.gmra.mrb[0].mxu1 %vm89_vm0, %v80_v19 }
 0x12f   :  { %v260_v24 = vpop.f32.mrb[0].mxu0  ;;  %v263_v26 = vpop.f32.mrb[0].mxu1 }
 0x130   :  { %v196_v28 = vmul.f32 %v260_v24, %v188_v20  ;;  %v198_v29 = vmul.f32 %v263_v26, %v190_v21  ;;  %v168_v30 = vpop.f32.mrb[1].mxu0  ;;  %v178_v32 = vpop.f32.mrb[1].mxu1 }
 0x131   :  { %v195_v34 = vmul.f32 %v187_v22, %v168_v30  ;;  %v197_v35 = vmul.f32 %v189_v23, %v178_v32 }
 0x132   :  { %v200_v36 = vadd.f32 %v196_v28, %v192_v25  ;;  %v202_v37 = vadd.f32 %v198_v29, %v194_v27 }
 0x133   :  { %v199_v38 = vadd.f32 %v195_v34, %v191_v31  ;;  %v201_v39 = vadd.f32 %v197_v35, %v193_v33 }
 0x134   :  { %204 = vst [vmem:[#allocation10 + $0x8] sm:$0xff] %v200_v36  ;;  %206 = vst [vmem:[#allocation10 + $0x18] sm:$0xff] %v202_v37 }
 0x135   :  { %203 = vst [vmem:[#allocation10] sm:$0xff] %v199_v38  ;;  %205 = vst [vmem:[#allocation10 + $0x10] sm:$0xff] %v201_v39 }
 0x136   :  { %394 = shalt.err (!%p391_p8)
}
 0x137   :  { %s395_s15 = scalar_lea.hbm %s542_s4, 512 }
 0x138   :  { %p396_p9 = scmp.ne.s32.totalorder %s542_s4, %s395_s15  ;;  %p399_p10 = scmp.lt.u32.totalorder %s395_s15, %s542_s4 }
 0x13a   :  { %p401_p11 = pnand %p399_p10, %p396_p9 }
 0x13c   :  { %404 = shalt.err (!%p401_p11)
}
 0x13d   :  { %218 = dma.vmem_to_hbm [thread:$0]  %s213_s12, 512, %s542_s4, [#allocation4], %s415_s27, %s415_s27, %s416_s28  }
 0x13e   :  { %411 = dma.done.wait [#allocation4], 512  }
 0x13f   :  { %412 = vsyncadd [#allocation4], 4294966784 }
 0x140   :  { %222 = vsyncpa [#allocation3], 1 }
 0x141   :  { %223 = vsyncpa [#allocation6], 1 }
 0x142   :  { %224 = vsyncpa [#allocation9], 1 }
 0x143   :  { %225 = vsyncpa [#allocation4], 1 }

</bundles_post_ra>
